<compile_context>
chip_gen: v5e
topology: v5e:2x2
jax: 0.10.0
libtpu: 0.0.40
codegen_flags: <defaults>
</compile_context>

<pallas_src>
import functools

import jax
import jax.numpy as jnp
import numpy as np
from jax import lax
from jax.experimental import pallas as pl
from jax.experimental.pallas import tpu as pltpu

_MiB = 1024 * 1024


def _round_up(x, m):
    return -(-x // m) * m


def _tpu_info():
    """(vmem_capacity_bytes, tensorcores_sharing_the_grid), with safe fallbacks."""
    vmem = None
    try:
        vmem = int(pltpu.get_tpu_info().vmem_capacity_bytes)
    except Exception:
        vmem = None
    kind = ""
    try:
        kind = jax.devices()[0].device_kind.lower()
    except Exception:
        pass
    if vmem is None:
        # v5e / v6e have 128 MiB physical VMEM; be conservative otherwise (v7x: 64).
        vmem = 128 * _MiB if ("v5" in kind or "v6" in kind) else 64 * _MiB
    cores = 2 if "v7" in kind else 1          # v7x: 2 TensorCores share the grid
    return vmem, cores


def _make_partial_kernel(threshold, batch, num_classes, tb, tiles_per_chunk, cls_ax):
    """Per-chunk kernel accumulating per-class mask counts and gathered
    -log_softmax sums directly into the chunk-resident output blocks.

    cls_ax == 1: blocks are (tb, C)  (row-major; classes on lanes)
    cls_ax == 0: blocks are (C, tb)  (transposed; batch on lanes)
    """
    inv_thr = (1.0 / float(threshold)) if threshold > 0 else None
    row_ax = 1 - cls_ax
    blk = (tb, num_classes) if cls_ax == 1 else (num_classes, tb)

    def kernel(weak_ref, strong_ref, counts_ref, loss_ref):
        j = pl.program_id(1)

        @pl.when(j == 0)
        def _init():
            counts_ref[...] = jnp.zeros_like(counts_ref)
            loss_ref[...] = jnp.zeros_like(loss_ref)

        weak = weak_ref[...].astype(jnp.float32)
        strong = strong_ref[...].astype(jnp.float32)

        col = lax.broadcasted_iota(jnp.int32, blk, cls_ax)

        # ---- weak branch: confidence mask + argmax one-hot -------------------
        w_max = jnp.max(weak, axis=cls_ax, keepdims=True)
        sumexp_w = jnp.sum(jnp.exp(weak - w_max), axis=cls_ax, keepdims=True)
        # max softmax prob = 1/sumexp_w; (1/sumexp_w > thr) <=> (sumexp_w < 1/thr)
        if inv_thr is not None:
            conf = sumexp_w < inv_thr
        else:
            conf = sumexp_w > 0.0                       # threshold <= 0: always true

        is_max = weak == w_max
        # first class index attaining the row max (ties -> lowest index)
        tgt = jnp.min(jnp.where(is_max, col, num_classes), axis=cls_ax, keepdims=True)
        onehot = (col == tgt).astype(jnp.float32)

        # rows past the true batch (partial tiles / clamped duplicate tiles)
        row0 = (pl.program_id(0) * tiles_per_chunk + j) * tb
        row_id = lax.broadcasted_iota(jnp.int32, conf.shape, row_ax) + row0
        valid = conf & (row_id < batch)
        maskf = jnp.where(valid, 1.0, 0.0)

        # ---- strong branch: -log_softmax gathered at the target --------------
        s_max = jnp.max(strong, axis=cls_ax, keepdims=True)
        lse = jnp.log(jnp.sum(jnp.exp(strong - s_max), axis=cls_ax, keepdims=True))
        s_t = jnp.sum(strong * onehot, axis=cls_ax, keepdims=True)
        # zero invalid rows (not just 0-weight them) so garbage out-of-bounds
        # data cannot poison the accumulator via 0 * Inf/NaN.
        per_row = jnp.where(valid, -(s_t - s_max - lse), 0.0)

        w = onehot * maskf
        counts_ref[...] += jnp.sum(w, axis=row_ax, keepdims=True)
        loss_ref[...] += jnp.sum(w * per_row, axis=row_ax, keepdims=True)

    return kernel


class OursLossGlobalPallas:
    """JAX/Pallas counterpart of the PyTorch OursLossGlobal module (forward)."""

    def __init__(self, threshold, reweight, num_classes, num_heads,
                 mean_outside_mask=False, use_count_ema=False, momentum=0.0,
                 data_len=None, reweight_renorm=False,
                 block_rows=None, force_chunks=None):
        self.threshold = float(threshold)
        self.reweight = bool(reweight)
        self.reweight_renorm = bool(reweight_renorm)
        self.mean_outside_mask = bool(mean_outside_mask)
        self.use_count_ema = bool(use_count_ema)
        self.momentum = float(momentum)
        self.data_len = data_len
        self.num_classes = int(num_classes)
        self.num_heads = int(num_heads)
        self.block_rows = block_rows        # test-only: cap rows per tile
        self.force_chunks = force_chunks    # test-only: force outer-chunk count
        self.vmem_capacity, self.num_cores = _tpu_info()
        # buffers (deterministic init, mirroring the torch module)
        self.num_counts = jnp.zeros((1,), dtype=jnp.int32)
        if self.use_count_ema:
            self.count_ema = jnp.ones((self.num_heads, self.num_classes),
                                      jnp.float32) / self.num_classes

    # ------------------------------------------------------------------ tiling
    def _plan(self, b, c, itemsize, transposed):
        if self.vmem_capacity >= 100 * _MiB:       # v5e / v6e: 128 MiB physical
            vmem_limit, tile_budget = 80 * _MiB, 16 * _MiB
        else:                                      # v7x: 64 MiB physical per TC
            vmem_limit, tile_budget = 48 * _MiB, 8 * _MiB

        sub_mult = max(8, 32 // itemsize)          # 8 (f32) / 16 (bf16) / 32 (i8)
        if transposed:
            align = 128                            # batch lives on the lane axis
            bytes_per_row = _round_up(c, sub_mult) * itemsize
        else:
            align = sub_mult                       # batch lives on sublanes
            bytes_per_row = _round_up(c, 128) * itemsize

        tb = tile_budget // max(1, bytes_per_row)
        if self.block_rows is not None:
            tb = min(tb, int(self.block_rows))
        tb = max(align, (tb // align) * align)
        if tb >= b:
            tb, num_tiles = b, 1                   # full-dim block: always legal
        else:
            num_tiles = -(-b // tb)

        num_chunks = 2 if (self.num_cores >= 2 and num_tiles >= 2) else 1
        if self.force_chunks is not None:
            num_chunks = max(1, min(int(self.force_chunks), num_tiles))
        tiles_per_chunk = -(-num_tiles // num_chunks)
        return tb, num_tiles, num_chunks, tiles_per_chunk, vmem_limit

    # ------------------------------------------------------------------ kernel
    @functools.partial(jax.jit, static_argnums=(0,))
    def _call_kernel(self, anchors_weak, anchors_strong):
        b, c = anchors_weak.shape
        itemsize = jnp.dtype(anchors_weak.dtype).itemsize

        # Small-C lane fix: put the batch on the 128-lane axis.  The one-off
        # transpose costs one extra HBM pass but removes the ~128/C lane waste
        # that makes the row-major kernel compute-bound for small num_classes.
        transposed = c < 128
        tb, num_tiles, num_chunks, tpc, vmem_limit = self._plan(
            b, c, itemsize, transposed)

        kernel = _make_partial_kernel(self.threshold, b, c, tb, tpc,
                                      cls_ax=0 if transposed else 1)

        if transposed:
            weak_in, strong_in = anchors_weak.T, anchors_strong.T      # (C, B)
            in_spec = pl.BlockSpec(
                (c, tb),
                lambda i, j: (0, jnp.minimum(i * tpc + j, num_tiles - 1)))
            out_block, out_dims = (None, c, 1), (num_chunks, c, 1)
        else:
            weak_in, strong_in = anchors_weak, anchors_strong          # (B, C)
            in_spec = pl.BlockSpec(
                (tb, c),
                lambda i, j: (jnp.minimum(i * tpc + j, num_tiles - 1), 0))
            out_block, out_dims = (None, 1, c), (num_chunks, 1, c)

        counts_p, loss_p = pl.pallas_call(
            kernel,
            out_shape=(jax.ShapeDtypeStruct(out_dims, jnp.float32),
                       jax.ShapeDtypeStruct(out_dims, jnp.float32)),
            grid_spec=pltpu.PrefetchScalarGridSpec(
                num_scalar_prefetch=0,
                grid=(num_chunks, tpc),
                in_specs=[in_spec, in_spec],
                out_specs=[pl.BlockSpec(out_block, lambda i, j: (i, 0, 0)),
                           pl.BlockSpec(out_block, lambda i, j: (i, 0, 0))]),
            compiler_params=pltpu.CompilerParams(
                dimension_semantics=("parallel", "arbitrary"),
                vmem_limit_bytes=vmem_limit),
        )(weak_in, strong_in)

        # ---- tiny O(C) epilogue: combine chunks, apply weights, normalize ----
        if transposed:
            counts = jnp.sum(counts_p[:, :, 0], axis=0)     # (C,)
            loss_pc = jnp.sum(loss_p[:, :, 0], axis=0)
        else:
            counts = jnp.sum(counts_p[:, 0, :], axis=0)
            loss_pc = jnp.sum(loss_p[:, 0, :], axis=0)
        n = jnp.sum(counts)

        if self.reweight:
            weight = jnp.where(counts > 0.0, n / jnp.maximum(counts, 1.0), 1.0)
            masked_sum = jnp.sum(weight * loss_pc)
            if self.mean_outside_mask:
                loss = masked_sum / float(b)
            else:
                weight_sum = jnp.sum(weight * counts)
                loss = masked_sum / jnp.maximum(weight_sum, 1e-12)
        else:
            masked_sum = jnp.sum(loss_pc)
            if self.mean_outside_mask:
                loss = masked_sum / float(b)
            else:
                loss = masked_sum / jnp.maximum(n, 1.0)

        # torch: if torch.all(mask == 0): return 0.0
        return jnp.where(n > 0.0, loss, 0.0)

    # ------------------------------------------------------------------ public
    def __call__(self, head_id, anchors_weak, anchors_strong):
        if head_id == 0:
            self.num_counts = self.num_counts + 1   # bookkeeping buffer only
        return self._call_kernel(anchors_weak, anchors_strong)


# ----------------------------- pure-JAX reference ----------------------------
def _reference_loss(weak, strong, threshold, reweight, mean_outside_mask):
    b, c = weak.shape
    prob = jax.nn.softmax(weak, axis=1)
    max_prob = prob.max(axis=1)
    target = prob.argmax(axis=1)
    mask = (max_prob > threshold).astype(jnp.float32)
    n = mask.sum()
    neg_logp = -jax.nn.log_softmax(strong, axis=1)
    if reweight:
        counts = jnp.zeros((c,), jnp.float32).at[target].add(mask)
        weight = jnp.where(counts > 0, n / jnp.maximum(counts, 1.0), 1.0)
        neg_logp = neg_logp * weight[None, :]
    per_row = neg_logp[jnp.arange(b), target]
    masked_sum = (per_row * mask).sum()
    if mean_outside_mask:
        loss = masked_sum / b
    elif reweight:
        wsum = (weight[target] * mask).sum()
        loss = masked_sum / jnp.maximum(wsum, 1e-12)
    else:
        loss = masked_sum / jnp.maximum(n, 1.0)
    return jnp.where(n > 0, loss, 0.0)


if __name__ == "__main__":
    key = jax.random.PRNGKey(0)
    k1, k2, k3, k4, k5, k6 = jax.random.split(key, 6)

    # 1) tiny config: single transposed tile (C < 128), whole batch in one block
    B1, C1 = 16, 8
    w1 = 2.0 * jax.random.normal(k1, (B1, C1), dtype=jnp.float32)
    s1 = 2.0 * jax.random.normal(k2, (B1, C1), dtype=jnp.float32)

    # 2) small-C tiled transposed path: partial last tile + clamped duplicate
    #    tile (force_chunks=2 exercises the multi-chunk combine on any chip)
    B2, C2 = 300, 10
    w2 = 2.0 * jax.random.normal(k3, (B2, C2), dtype=jnp.float32)
    s2 = 2.0 * jax.random.normal(k4, (B2, C2), dtype=jnp.float32)

    # 3) large-C row-major path (C >= 128): partial tile + clamped duplicate
    B3, C3 = 90, 160
    w3 = 2.0 * jax.random.normal(k5, (B3, C3), dtype=jnp.float32)
    s3 = 2.0 * jax.random.normal(k6, (B3, C3), dtype=jnp.float32)

    cases = [
        (w1, s1, C1, dict(block_rows=None, force_chunks=None),
         [dict(reweight=False, mean_outside_mask=False),
          dict(reweight=True, mean_outside_mask=False),
          dict(reweight=False, mean_outside_mask=True),
          dict(reweight=True, mean_outside_mask=True)]),
        (w2, s2, C2, dict(block_rows=128, force_chunks=2),
         [dict(reweight=False, mean_outside_mask=False),
          dict(reweight=True, mean_outside_mask=False)]),
        (w3, s3, C3, dict(block_rows=32, force_chunks=2),
         [dict(reweight=False, mean_outside_mask=False),
          dict(reweight=True, mean_outside_mask=True)]),
    ]

    for w, s, C, tiling, cfgs in cases:
        for cfg in cfgs:
            mod = OursLossGlobalPallas(threshold=0.2, num_classes=C, num_heads=1,
                                       **tiling, **cfg)
            loss = jax.block_until_ready(mod(0, w, s))
            ref = _reference_loss(w, s, 0.2, cfg["reweight"],
                                  cfg["mean_outside_mask"])
            np.testing.assert_allclose(np.asarray(loss), np.asarray(ref),
                                       rtol=1e-4, atol=1e-5)

    print("KERNEL_OK")
</pallas_src>

<mosaic_0001>
module attributes {stable_mosaic.version = 11 : i64} {
  func.func @kernel(%arg0: i32, %arg1: i32, %arg2: memref<8x16xf32, #tpu.memory_space<vmem>>, %arg3: memref<8x16xf32, #tpu.memory_space<vmem>>, %arg4: memref<1x8x1xf32, #tpu.memory_space<vmem>>, %arg5: memref<1x8x1xf32, #tpu.memory_space<vmem>>) attributes {dimension_semantics = [#tpu.dimension_semantics<parallel>, #tpu.dimension_semantics<arbitrary>], iteration_bounds = array<i64: 1, 1>, scalar_prefetch = 0 : i64, scratch_operands = 0 : i64, tpu.core_type = #tpu.core_type<tc>, window_params = [{transform_indices = @transform_0, window_bounds = array<i64: 8, 16>}, {transform_indices = @transform_1, window_bounds = array<i64: 8, 16>}, {transform_indices = @transform_2, window_bounds = array<i64: 1, 8, 1>}, {transform_indices = @transform_3, window_bounds = array<i64: 1, 8, 1>}]} {
    %c0_i32 = arith.constant 0 : i32
    %0 = arith.cmpi eq, %arg1, %c0_i32 : i32
    %1 = arith.extui %0 : i1 to i32
    %c0_i32_0 = arith.constant 0 : i32
    %2 = arith.cmpi ne, %1, %c0_i32_0 : i32
    scf.if %2 {
      %cst_29 = arith.constant 0.000000e+00 : f32
      %74 = vector.broadcast %cst_29 : f32 to vector<8x1xf32>
      %c0_30 = arith.constant 0 : index
      %c0_31 = arith.constant 0 : index
      %c0_32 = arith.constant 0 : index
      %75 = vector.load %arg4[%c0_30, %c0_31, %c0_32] : memref<1x8x1xf32, #tpu.memory_space<vmem>>, vector<1x8x1xf32>
      %76 = vector.shape_cast %75 : vector<1x8x1xf32> to vector<8x1xf32>
      %77 = vector.shape_cast %74 : vector<8x1xf32> to vector<1x8x1xf32>
      tpu.vector_store %arg4[%c0_30, %c0_31, %c0_32], %77 {strides = array<i32>} : memref<1x8x1xf32, #tpu.memory_space<vmem>>, vector<1x8x1xf32>,
      %cst_33 = arith.constant 0.000000e+00 : f32
      %78 = vector.broadcast %cst_33 : f32 to vector<8x1xf32>
      %c0_34 = arith.constant 0 : index
      %c0_35 = arith.constant 0 : index
      %c0_36 = arith.constant 0 : index
      %79 = vector.load %arg5[%c0_34, %c0_35, %c0_36] : memref<1x8x1xf32, #tpu.memory_space<vmem>>, vector<1x8x1xf32>
      %80 = vector.shape_cast %79 : vector<1x8x1xf32> to vector<8x1xf32>
      %81 = vector.shape_cast %78 : vector<8x1xf32> to vector<1x8x1xf32>
      tpu.vector_store %arg5[%c0_34, %c0_35, %c0_36], %81 {strides = array<i32>} : memref<1x8x1xf32, #tpu.memory_space<vmem>>, vector<1x8x1xf32>,
    } else {
    }
    %c0 = arith.constant 0 : index
    %c0_1 = arith.constant 0 : index
    %3 = vector.load %arg2[%c0, %c0_1] : memref<8x16xf32, #tpu.memory_space<vmem>>, vector<8x16xf32>
    %c0_2 = arith.constant 0 : index
    %c0_3 = arith.constant 0 : index
    %4 = vector.load %arg3[%c0_2, %c0_3] : memref<8x16xf32, #tpu.memory_space<vmem>>, vector<8x16xf32>
    %5 = tpu.iota {dimensions = array<i32: 0>} : vector<8x16xi32>
    %cst = arith.constant dense<0xFF800000> : vector<16xf32>
    %6 = vector.multi_reduction <maximumf>, %3, %cst [0] : vector<8x16xf32> to vector<16xf32>
    %7 = vector.shape_cast %6 : vector<16xf32> to vector<1x16xf32>
    %8 = vector.broadcast %7 : vector<1x16xf32> to vector<8x16xf32>
    %9 = arith.subf %3, %8 : vector<8x16xf32>
    %10 = math.exp %9 : vector<8x16xf32>
    %cst_4 = arith.constant dense<0.000000e+00> : vector<16xf32>
    %11 = vector.multi_reduction <add>, %10, %cst_4 [0] : vector<8x16xf32> to vector<16xf32>
    %12 = vector.shape_cast %11 : vector<16xf32> to vector<1x16xf32>
    %cst_5 = arith.constant 5.000000e+00 : f32
    %13 = vector.broadcast %cst_5 : f32 to vector<1x16xf32>
    %14 = arith.cmpf olt, %12, %13 : vector<1x16xf32>
    %15 = vector.broadcast %7 : vector<1x16xf32> to vector<8x16xf32>
    %16 = arith.cmpf oeq, %3, %15 : vector<8x16xf32>
    %c8_i32 = arith.constant 8 : i32
    %17 = vector.broadcast %c8_i32 : i32 to vector<8x16xi32>
    %18 = arith.select %16, %5, %17 : vector<8x16xi1>, vector<8x16xi32>
    %cst_6 = arith.constant dense<2147483647> : vector<16xi32>
    %19 = vector.multi_reduction <minsi>, %18, %cst_6 [0] : vector<8x16xi32> to vector<16xi32>
    %20 = vector.shape_cast %19 : vector<16xi32> to vector<1x16xi32>
    %21 = vector.broadcast %20 : vector<1x16xi32> to vector<8x16xi32>
    %22 = arith.cmpi eq, %5, %21 : vector<8x16xi32>
    %23 = arith.extui %22 : vector<8x16xi1> to vector<8x16xi32>
    %24 = arith.sitofp %23 : vector<8x16xi32> to vector<8x16xf32>
    %c1_i32 = arith.constant 1 : i32
    %25 = arith.muli %arg0, %c1_i32 : i32
    %26 = arith.addi %25, %arg1 : i32
    %c16_i32 = arith.constant 16 : i32
    %27 = arith.muli %26, %c16_i32 : i32
    %28 = tpu.iota {dimensions = array<i32: 1>} : vector<1x16xi32>
    %29 = vector.broadcast %27 : i32 to vector<1x16xi32>
    %30 = arith.addi %28, %29 : vector<1x16xi32>
    %c16_i32_7 = arith.constant 16 : i32
    %31 = vector.broadcast %c16_i32_7 : i32 to vector<1x16xi32>
    %32 = arith.cmpi slt, %30, %31 : vector<1x16xi32>
    %33 = arith.andi %14, %32 : vector<1x16xi1>
    %cst_8 = arith.constant 1.000000e+00 : f32
    %cst_9 = arith.constant 0.000000e+00 : f32
    %34 = vector.broadcast %cst_8 : f32 to vector<1x16xf32>
    %35 = vector.broadcast %cst_9 : f32 to vector<1x16xf32>
    %36 = arith.select %33, %34, %35 : vector<1x16xi1>, vector<1x16xf32>
    %cst_10 = arith.constant dense<0xFF800000> : vector<16xf32>
    %37 = vector.multi_reduction <maximumf>, %4, %cst_10 [0] : vector<8x16xf32> to vector<16xf32>
    %38 = vector.shape_cast %37 : vector<16xf32> to vector<1x16xf32>
    %39 = vector.broadcast %38 : vector<1x16xf32> to vector<8x16xf32>
    %40 = arith.subf %4, %39 : vector<8x16xf32>
    %41 = math.exp %40 : vector<8x16xf32>
    %cst_11 = arith.constant dense<0.000000e+00> : vector<16xf32>
    %42 = vector.multi_reduction <add>, %41, %cst_11 [0] : vector<8x16xf32> to vector<16xf32>
    %43 = vector.shape_cast %42 : vector<16xf32> to vector<1x16xf32>
    %44 = math.log %43 : vector<1x16xf32>
    %45 = arith.mulf %4, %24 : vector<8x16xf32>
    %cst_12 = arith.constant dense<0.000000e+00> : vector<16xf32>
    %46 = vector.multi_reduction <add>, %45, %cst_12 [0] : vector<8x16xf32> to vector<16xf32>
    %47 = vector.shape_cast %46 : vector<16xf32> to vector<1x16xf32>
    %48 = arith.subf %47, %38 : vector<1x16xf32>
    %49 = arith.subf %48, %44 : vector<1x16xf32>
    %cst_13 = arith.constant 0.000000e+00 : f32
    %50 = vector.broadcast %cst_13 : f32 to vector<1x16xf32>
    %51 = arith.subf %50, %49 : vector<1x16xf32>
    %cst_14 = arith.constant 0.000000e+00 : f32
    %52 = vector.broadcast %cst_14 : f32 to vector<1x16xf32>
    %53 = arith.select %33, %51, %52 : vector<1x16xi1>, vector<1x16xf32>
    %54 = vector.broadcast %36 : vector<1x16xf32> to vector<8x16xf32>
    %55 = arith.mulf %24, %54 : vector<8x16xf32>
    %c0_15 = arith.constant 0 : index
    %c0_16 = arith.constant 0 : index
    %c0_17 = arith.constant 0 : index
    %56 = vector.load %arg4[%c0_15, %c0_16, %c0_17] : memref<1x8x1xf32, #tpu.memory_space<vmem>>, vector<1x8x1xf32>
    %57 = vector.shape_cast %56 : vector<1x8x1xf32> to vector<8x1xf32>
    %cst_18 = arith.constant dense<0.000000e+00> : vector<8xf32>
    %58 = vector.multi_reduction <add>, %55, %cst_18 [1] : vector<8x16xf32> to vector<8xf32>
    %59 = vector.shape_cast %58 : vector<8xf32> to vector<8x1xf32>
    %60 = arith.addf %57, %59 : vector<8x1xf32>
    %c0_19 = arith.constant 0 : index
    %c0_20 = arith.constant 0 : index
    %c0_21 = arith.constant 0 : index
    %61 = vector.load %arg4[%c0_19, %c0_20, %c0_21] : memref<1x8x1xf32, #tpu.memory_space<vmem>>, vector<1x8x1xf32>
    %62 = vector.shape_cast %61 : vector<1x8x1xf32> to vector<8x1xf32>
    %63 = vector.shape_cast %60 : vector<8x1xf32> to vector<1x8x1xf32>
    tpu.vector_store %arg4[%c0_19, %c0_20, %c0_21], %63 {strides = array<i32>} : memref<1x8x1xf32, #tpu.memory_space<vmem>>, vector<1x8x1xf32>,
    %c0_22 = arith.constant 0 : index
    %c0_23 = arith.constant 0 : index
    %c0_24 = arith.constant 0 : index
    %64 = vector.load %arg5[%c0_22, %c0_23, %c0_24] : memref<1x8x1xf32, #tpu.memory_space<vmem>>, vector<1x8x1xf32>
    %65 = vector.shape_cast %64 : vector<1x8x1xf32> to vector<8x1xf32>
    %66 = vector.broadcast %53 : vector<1x16xf32> to vector<8x16xf32>
    %67 = arith.mulf %55, %66 : vector<8x16xf32>
    %cst_25 = arith.constant dense<0.000000e+00> : vector<8xf32>
    %68 = vector.multi_reduction <add>, %67, %cst_25 [1] : vector<8x16xf32> to vector<8xf32>
    %69 = vector.shape_cast %68 : vector<8xf32> to vector<8x1xf32>
    %70 = arith.addf %65, %69 : vector<8x1xf32>
    %c0_26 = arith.constant 0 : index
    %c0_27 = arith.constant 0 : index
    %c0_28 = arith.constant 0 : index
    %71 = vector.load %arg5[%c0_26, %c0_27, %c0_28] : memref<1x8x1xf32, #tpu.memory_space<vmem>>, vector<1x8x1xf32>
    %72 = vector.shape_cast %71 : vector<1x8x1xf32> to vector<8x1xf32>
    %73 = vector.shape_cast %70 : vector<8x1xf32> to vector<1x8x1xf32>
    tpu.vector_store %arg5[%c0_26, %c0_27, %c0_28], %73 {strides = array<i32>} : memref<1x8x1xf32, #tpu.memory_space<vmem>>, vector<1x8x1xf32>,
    return
  }
  func.func @transform_0(%arg0: i32, %arg1: i32) -> (i32, i32) {
    %c1_i32 = arith.constant 1 : i32
    %0 = arith.muli %arg0, %c1_i32 : i32
    %1 = arith.addi %0, %arg1 : i32
    %c0_i32 = arith.constant 0 : i32
    %2 = arith.minsi %1, %c0_i32 : i32
    %c0_i32_0 = arith.constant 0 : i32
    %c0_i32_1 = arith.constant 0 : i32
    return %c0_i32_0, %2 : i32, i32
  }
  func.func @transform_1(%arg0: i32, %arg1: i32) -> (i32, i32) {
    %c1_i32 = arith.constant 1 : i32
    %0 = arith.muli %arg0, %c1_i32 : i32
    %1 = arith.addi %0, %arg1 : i32
    %c0_i32 = arith.constant 0 : i32
    %2 = arith.minsi %1, %c0_i32 : i32
    %c0_i32_0 = arith.constant 0 : i32
    %c0_i32_1 = arith.constant 0 : i32
    return %c0_i32_0, %2 : i32, i32
  }
  func.func @transform_2(%arg0: i32, %arg1: i32) -> (i32, i32, i32) {
    %c0_i32 = arith.constant 0 : i32
    %c0_i32_0 = arith.constant 0 : i32
    %c0_i32_1 = arith.constant 0 : i32
    return %arg0, %c0_i32, %c0_i32_0 : i32, i32, i32
  }
  func.func @transform_3(%arg0: i32, %arg1: i32) -> (i32, i32, i32) {
    %c0_i32 = arith.constant 0 : i32
    %c0_i32_0 = arith.constant 0 : i32
    %c0_i32_1 = arith.constant 0 : i32
    return %arg0, %c0_i32, %c0_i32_0 : i32, i32, i32
  }
}

</mosaic_0001>

<bundles_post_ra>
// kernel: _call_kernel.1
= control target key start
LH: loop header
LB: loop body
LE: loop exit
PB: predicated region body
PF: predicated region fallthrough
CT: control target
= control target key end

     0   :  { %9 = vsyncpa [#allocation3], 0  ;;  %s296_s0 = inlined_call_operand.hbm [shape: f32[8,16], index: 0, kind: input, shape index: {}]   ;;  %s297_s1 = inlined_call_operand.hbm [shape: f32[8,16], index: 1, kind: input, shape index: {}]   ;;  %s298_s2 = inlined_call_operand.vmem [shape: f32[1,8,1], index: 2, kind: output, shape index: {0}]   ;;  %s299_s3 = inlined_call_operand.vmem [shape: f32[1,8,1], index: 3, kind: output, shape index: {1}]  }
   0x1   :  { %s21_s14 = sshll.u32 %s296_s0, 4  ;;  %s22_s14 = int_to_ptr.hbm [resolvable:$true] %s21_s14 }
   0x2   :  { %10 = vsyncpa [#allocation5], 0  ;;  %s233_s15 = smov [#allocation2]   ;;  %s37_s19 = sshll.u32 %s297_s1, 4  ;;  %s38_s19 = int_to_ptr.hbm [resolvable:$true] %s37_s19 }
   0x3   :  { %s23_s16 = sshll.u32 %s233_s15, 4  ;;  %s234_s20 = smov [#allocation4]   ;;  %s24_s16 = int_to_ptr.vmem [resolvable:$true] %s23_s16 }
   0x4   :  { %26 = dma.hbm_to_vmem [thread:$0]  %s22_s14, 128, %s24_s16, [#allocation3]  }
   0x5   :  { %s39_s21 = sshll.u32 %s234_s20, 4  ;;  %s40_s21 = int_to_ptr.vmem [resolvable:$true] %s39_s21 }
   0x6   :  { %42 = dma.hbm_to_vmem [thread:$0]  %s38_s19, 128, %s40_s21, [#allocation5]  }
   0x7   :  { %229 = dma.done.wait [#allocation3], 128  }
   0x8   :  { %230 = vsyncadd [#allocation3], 4294967168 }
   0x9   :  { %231 = dma.done.wait [#allocation5], 128  }
   0xa   :  { %232 = vsyncadd [#allocation5], 4294967168  ;;  %vm61_vm0 = vcmask 7168   ;;  %v235_v0 = vmov 0.0   ;;  %vm68_vm1 = vcmask 130048   ;;  %v64_v1 = vld [vmem:[#allocation2] sm:$0xff]  ;;  %v66_v11 = vlaneseq }
   0xb   :  { %62 = vst.msk [vmem:[%s298_s2] sm:$0xff] %vm61_vm0, %v235_v0  ;;  %v65_v2 = vld [vmem:[#allocation4] sm:$0xff]  ;;  %v69_v3 = vsel %vm68_vm1, %v64_v1, -inf }
   0xc   :  { %63 = vst.msk [vmem:[%s299_s3] sm:$0xff] %vm61_vm0, %v235_v0  ;;  %v111_v4 = vsel %vm68_vm1, %v65_v2, -inf  ;;  %v70_v5 = vrot.slane %v69_v3, 4  ;;  %v67_v16 = vshrl.u32 %v66_v11, 7  ;;  %v105_v44 = vand.u32 127, %v66_v11 }
   0xd   :  { %v112_v6 = vrot.slane %v111_v4, 4 }
   0xe   :  { %v71_v7 = vmax.f32 %v69_v3, %v70_v5  ;;  %vm108_vm7 = vcmp.lt.s32.totalorder %v105_v44, 16 }
   0xf   :  { %v113_v8 = vmax.f32 %v111_v4, %v112_v6 }
  0x10   :  { %v72_v9 = vrot.slane %v71_v7, 2 }
  0x11   :  { %v114_v10 = vrot.slane %v113_v8, 2 }
  0x12   :  { %v73_v12 = vmax.f32 %v71_v7, %v72_v9 }
  0x13   :  { %v115_v13 = vmax.f32 %v113_v8, %v114_v10  ;;  %v150_v7 = vld [vmem:[%s299_s3] sm:$0xff] }
  0x14   :  { %v74_v14 = vrot.slane %v73_v12, 1 }
  0x15   :  { %v116_v15 = vrot.slane %v115_v13, 1 }
  0x16   :  { %v75_v17 = vmax.f32 %v73_v12, %v74_v14 }
  0x17   :  { %v117_v18 = vmax.f32 %v115_v13, %v116_v15 }
  0x18   :  { %v76_v19 = vsub.f32 %v64_v1, %v75_v17  ;;  %vm87_vm2 = vcmp.eq.f32.partialorder %v64_v1, %v75_v17 }
  0x19   :  { %v118_v20 = vsub.f32 %v65_v2, %v117_v18  ;;  %v88_v21 = vsel %vm87_vm2, %v67_v16, 8 }
  0x1a   :  { %v77_v22 = vmul.f32 1.442695, %v76_v19  ;;  %v89_v23 = vsel %vm68_vm1, %v88_v21, 2147483647 }
  0x1b   :  { %v119_v24 = vmul.f32 1.442695, %v118_v20  ;;  %v90_v25 = vrot.slane %v89_v23, 4 }
  0x1c   :  { %175 = vpow2.f32 %v77_v22 }
  0x1d   :  { %vm91_vm3 = vcmp.lt.s32.totalorder %v89_v23, %v90_v25  ;;  %177 = vpow2.f32 %v119_v24 }
  0x1e   :  { %v92_v26 = vsel %vm91_vm3, %v89_v23, %v90_v25 }
  0x1f   :  { %v93_v27 = vrot.slane %v92_v26, 2 }
  0x21   :  { %vm94_vm4 = vcmp.lt.s32.totalorder %v92_v26, %v93_v27 }
  0x22   :  { %v176_v28 = vpop.eup %175  ;;  %v95_v29 = vsel %vm94_vm4, %v92_v26, %v93_v27 }
  0x23   :  { %v178_v30 = vpop.eup %177  ;;  %v79_v31 = vsel %vm68_vm1, %v176_v28, 0.0  ;;  %v96_v32 = vrot.slane %v95_v29, 1 }
  0x24   :  { %v80_v33 = vrot.slane %v79_v31, 4  ;;  %v121_v34 = vsel %vm68_vm1, %v178_v30, 0.0 }
  0x25   :  { %vm97_vm5 = vcmp.lt.s32.totalorder %v95_v29, %v96_v32  ;;  %v122_v35 = vrot.slane %v121_v34, 4 }
  0x26   :  { %v81_v36 = vadd.f32 %v80_v33, %v79_v31  ;;  %v98_v37 = vsel %vm97_vm5, %v95_v29, %v96_v32 }
  0x27   :  { %vm99_vm6 = vcmp.eq.s32.totalorder %v67_v16, %v98_v37  ;;  %v123_v38 = vadd.f32 %v122_v35, %v121_v34 }
  0x28   :  { %v82_v39 = vrot.slane %v81_v36, 2  ;;  %v171_v40 = vsel %vm99_vm6, 1.0, %v235_v0 }
  0x29   :  { %v130_v41 = vmul.f32 %v171_v40, %v65_v2  ;;  %v124_v42 = vrot.slane %v123_v38, 2 }
  0x2a   :  { %v83_v43 = vadd.f32 %v82_v39, %v81_v36 }
  0x2b   :  { %v131_v45 = vsel %vm68_vm1, %v130_v41, 0.0  ;;  %v125_v46 = vadd.f32 %v124_v42, %v123_v38 }
  0x2c   :  { %v84_v47 = vrot.slane %v83_v43, 1  ;;  %v132_v48 = vrot.slane %v131_v45, 4 }
  0x2d   :  { %v126_v49 = vrot.slane %v125_v46, 1 }
  0x2e   :  { %v85_v50 = vadd.f32 %v84_v47, %v83_v43  ;;  %v133_v51 = vadd.f32 %v132_v48, %v131_v45 }
  0x2f   :  { %v127_v52 = vadd.f32 %v126_v49, %v125_v46 }
  0x30   :  { %vm86_vm8 = vcmp.lt.f32.partialorder %v85_v50, 5.0  ;;  %v134_v53 = vrot.slane %v133_v51, 2 }
  0x31   :  { %vm109_vm9 = vmand %vm86_vm8, %vm108_vm7  ;;  %179 = vlog2.f32 %v127_v52 }
  0x32   :  { %v110_v54 = vsel %vm109_vm9, 1.0, %v235_v0  ;;  %v135_v55 = vadd.f32 %v134_v53, %v133_v51  ;;  %v143_v0 = vld [vmem:[%s298_s2] sm:$0xff] }
  0x33   :  { %v142_v56 = vmul.f32 %v171_v40, %v110_v54 }
  0x34   :  { %v136_v57 = vrot.slane %v135_v55, 1 }
  0x35   :  { %v144_v58 = vsel %vm68_vm1, %v142_v56, 0.0 }
  0x36   :  { %145 = vadd.xlane.f32.xlu0 %v144_v58  ;;  %v137_v59 = vadd.f32 %v136_v57, %v135_v55 }
  0x37   :  { %v180_v60 = vpop.eup %179 }
  0x38   :  { %v129_v61 = vmul.f32 0.6931472, %v180_v60  ;;  %v138_v62 = vsub.f32 %v137_v59, %v117_v18 }
  0x3a   :  { %v139_v63 = vsub.f32 %v138_v62, %v129_v61 }
  0x3c   :  { %v140_v1 = vsub.f32 0.0, %v139_v63 }
  0x3e   :  { %v141_v2 = vsel %vm109_vm9, %v140_v1, 0.0 }
  0x3f   :  { %v151_v3 = vmul.f32 %v142_v56, %v141_v2 }
  0x41   :  { %v152_v4 = vsel %vm68_vm1, %v151_v3, 0.0 }
  0x42   :  { %153 = vadd.xlane.f32.xlu0 %v152_v4 }
  0xa9   :  { %v146_v5 = vpop.xlane.xlu0 %145 }
  0xaa   :  { %v147_v6 = vadd.f32 %v146_v5, %v143_v0 }
  0xac   :  { %149 = vst.msk [vmem:[%s298_s2] sm:$0xff] %vm61_vm0, %v147_v6 }
  0xb5   :  { %v154_v8 = vpop.xlane.xlu0 %153 }
  0xb6   :  { %v155_v9 = vadd.f32 %v154_v8, %v150_v7 }
  0xb8   :  { %156 = vst.msk [vmem:[%s299_s3] sm:$0xff] %vm61_vm0, %v155_v9 }
  0xb9   :  { %165 = vsyncpa [#allocation3], 1 }
  0xba   :  { %166 = vsyncpa [#allocation5], 1 }

</bundles_post_ra>
